<compile_context>
chip_gen: v5e
topology: v5e:2x2
jax: 0.10.0
libtpu: 0.0.40
codegen_flags: <defaults>
</compile_context>

<pallas_src>
import functools

import jax
import jax.numpy as jnp
import numpy as np
from jax.experimental import pallas as pl
from jax.experimental.pallas import tpu as pltpu


def _bernoulli_threshold_u32(p):
    """uint32 threshold so that (uint32_bits < thr) ~ Bernoulli(p)."""
    return np.uint32(min(max(int(round(float(p) * 2.0 ** 32)), 0), 2 ** 32 - 1))


# --------------------------------- kernel ------------------------------------
def masker_kernel(embed_mode, thr_mask, thr_zero, thr_rand, tn_pad,
                  x_ref, bits_ref, out_ref, mask_ref):
    x = x_ref[...]                                        # (8k, TNp) f32, lane-dense

    # single lane-dense u32 slab, statically sliced into its four uses
    g_bits = bits_ref[:, 0 * tn_pad:1 * tn_pad]           # group-constant bits
    z_bits = bits_ref[:, 1 * tn_pad:2 * tn_pad]           # zero-out bits
    r_bits = bits_ref[:, 2 * tn_pad:3 * tn_pad]           # random-replace bits
    v_bits = bits_ref[:, 3 * tn_pad:4 * tn_pad]           # value-uniform bits

    # Bernoulli decisions as raw-uint32 integer compares (no float conversion)
    mask_b = g_bits < jnp.uint32(thr_mask)                # element-level mask
    zero_sel = (z_bits < jnp.uint32(thr_zero)) & mask_b
    x1 = jnp.where(zero_sel, 0.0, x)
    rand_sel = (r_bits < jnp.uint32(thr_rand)) & mask_b & jnp.logical_not(zero_sel)

    # torch computes spikes.max() AFTER the in-place zeroing; padded entries are
    # zero and spike counts are non-negative, so padding never wins the max.
    max_val = jnp.max(x1, keepdims=True)                  # (1, 1)

    # U[0,1) via the mantissa bit-trick, only where a float value is needed
    uu = jax.lax.bitcast_convert_type(
        (v_bits >> 9) | jnp.uint32(0x3F800000), jnp.float32) - 1.0
    rnd = max_val * uu
    if embed_mode == "identity":
        rnd = jnp.round(rnd)                              # round-half-to-even, like torch

    out_ref[...] = jnp.where(rand_sel, rnd, x1)
    mask_ref[...] = mask_b.astype(jnp.int8)               # int8 mask: 4x fewer bytes


# -------------------------------- wrapper ------------------------------------
def masker(spikes, key, *, mode="timestep", embed_mode="identity",
           ratio=0.5, zero_ratio=0.6, random_ratio=0.5, n_time_steps=4):
    """spikes: (B, T, N) float32.  Returns (masked_spikes, mask) both (B, T, N)."""
    Bsz, T, N = spikes.shape
    assert T % n_time_steps == 0, "T must be divisible by n_time_steps"
    patch = T // n_time_steps
    TN = T * N

    if mode == "timestep":
        gpb, group_width = n_time_steps, patch * N        # groups/batch, lanes/group
    elif mode == "full":
        gpb, group_width = n_time_steps * patch, N
    else:
        raise ValueError(f"Masking mode {mode} not implemented")

    # pad to full (8, 128k) vregs: full-width loads/stores and a safe global max
    B_pad = ((Bsz + 7) // 8) * 8
    TN_pad = ((TN + 127) // 128) * 128
    assert gpb <= TN_pad, "demo-sized kernel: groups-per-batch must fit one slab row"

    x2d = jnp.zeros((B_pad, TN_pad), jnp.float32).at[:Bsz, :TN].set(
        spikes.reshape(Bsz, TN).astype(jnp.float32))

    # ONE host RNG draw; group-level bits are expanded to element granularity
    # host-side with a static repeat (replaces the in-kernel selector matmul).
    raw = jax.random.bits(key, (B_pad, 4 * TN_pad), dtype=jnp.uint32)
    grp = jnp.repeat(raw[:, :gpb], group_width, axis=-1)             # (B_pad, TN)
    grp = jnp.pad(grp, ((0, 0), (0, TN_pad - TN)),
                  constant_values=np.uint32(0xFFFFFFFF))             # pad lanes never masked
    bits = jnp.concatenate([grp, raw[:, TN_pad:]], axis=-1)          # (B_pad, 4*TN_pad)

    kernel = functools.partial(
        masker_kernel, embed_mode,
        _bernoulli_threshold_u32(ratio),
        _bernoulli_threshold_u32(zero_ratio),
        _bernoulli_threshold_u32(random_ratio),
        TN_pad)

    out2d, mask2d = pl.pallas_call(
        kernel,
        out_shape=(jax.ShapeDtypeStruct((B_pad, TN_pad), jnp.float32),
                   jax.ShapeDtypeStruct((B_pad, TN_pad), jnp.int8)),
        in_specs=[
            pl.BlockSpec(memory_space=pltpu.MemorySpace.VMEM),   # spikes slab
            pl.BlockSpec(memory_space=pltpu.MemorySpace.VMEM),   # random-bits slab
        ],
        out_specs=(
            pl.BlockSpec(memory_space=pltpu.MemorySpace.VMEM),
            pl.BlockSpec(memory_space=pltpu.MemorySpace.VMEM),
        ),
    )(x2d, bits)

    out = out2d[:Bsz, :TN].reshape(Bsz, T, N)
    # TODO(synk): PyTorch returns an int64 mask; JAX x64 is disabled by default,
    # so the int8 kernel mask is widened to int32 here (fuses into XLA for free).
    mask = mask2d[:Bsz, :TN].astype(jnp.int32).reshape(Bsz, T, N)
    return out, mask


# ---------------------------------- main -------------------------------------
if __name__ == "__main__":
    B, T, N = 2, 8, 32          # batch, total tokens, neurons (T = n_time_steps * patch)
    NTS = 4                     # n_time_steps  -> patch = 2

    key = jax.random.PRNGKey(0)
    k_spk, k_mask = jax.random.split(key)
    # spike-count-like non-negative integers as floats
    spikes = jax.random.randint(k_spk, (B, T, N), 0, 6).astype(jnp.float32)

    out, mask = masker(spikes, k_mask, mode="timestep", embed_mode="identity",
                       ratio=0.5, zero_ratio=0.6, random_ratio=0.5,
                       n_time_steps=NTS)
    out = jax.block_until_ready(out)
    mask = jax.block_until_ready(mask)

    spk = np.asarray(spikes)
    o = np.asarray(out)
    m = np.asarray(mask)

    # --- semantic invariants (hold for any random draw) -----------------------
    assert o.shape == (B, T, N) and m.shape == (B, T, N)
    assert set(np.unique(m).tolist()).issubset({0, 1})
    # unmasked entries are passed through untouched
    np.testing.assert_array_equal(o[m == 0], spk[m == 0])
    # 'timestep' mode: mask is constant over (patch, neuron) within each (batch, timestep)
    m4 = m.reshape(B, NTS, T // NTS, N)
    assert np.all(m4 == m4[:, :, :1, :1])
    assert np.all(np.isfinite(o))

    print("KERNEL_OK")
</pallas_src>

<mosaic_0001>
module attributes {stable_mosaic.version = 11 : i64} {
  func.func @masker_kernel(%arg0: memref<8x256xf32, #tpu.memory_space<vmem>>, %arg1: memref<8x1024xi32, #tpu.memory_space<vmem>>, %arg2: memref<8x256xf32, #tpu.memory_space<vmem>>, %arg3: memref<8x256xi8, #tpu.memory_space<vmem>>) attributes {dimension_semantics = [], scalar_prefetch = 0 : i64, scratch_operands = 0 : i64, tpu.core_type = #tpu.core_type<tc>} {
    %c0 = arith.constant 0 : index
    %c0_0 = arith.constant 0 : index
    %0 = vector.load %arg0[%c0, %c0_0] : memref<8x256xf32, #tpu.memory_space<vmem>>, vector<8x256xf32>
    %c0_1 = arith.constant 0 : index
    %c0_2 = arith.constant 0 : index
    %1 = vector.load %arg1[%c0_1, %c0_2] : memref<8x1024xi32, #tpu.memory_space<vmem>>, vector<8x256xi32>
    %c0_3 = arith.constant 0 : index
    %c256 = arith.constant 256 : index
    %2 = vector.load %arg1[%c0_3, %c256] : memref<8x1024xi32, #tpu.memory_space<vmem>>, vector<8x256xi32>
    %c0_4 = arith.constant 0 : index
    %c512 = arith.constant 512 : index
    %3 = vector.load %arg1[%c0_4, %c512] : memref<8x1024xi32, #tpu.memory_space<vmem>>, vector<8x256xi32>
    %c0_5 = arith.constant 0 : index
    %c768 = arith.constant 768 : index
    %4 = vector.load %arg1[%c0_5, %c768] : memref<8x1024xi32, #tpu.memory_space<vmem>>, vector<8x256xi32>
    %c-2147483648_i32 = arith.constant -2147483648 : i32
    %5 = vector.broadcast %c-2147483648_i32 : i32 to vector<8x256xi32>
    %6 = arith.cmpi ult, %1, %5 : vector<8x256xi32>
    %c-1717986918_i32 = arith.constant -1717986918 : i32
    %7 = vector.broadcast %c-1717986918_i32 : i32 to vector<8x256xi32>
    %8 = arith.cmpi ult, %2, %7 : vector<8x256xi32>
    %9 = arith.andi %8, %6 : vector<8x256xi1>
    %cst = arith.constant 0.000000e+00 : f32
    %10 = vector.broadcast %cst : f32 to vector<8x256xf32>
    %11 = arith.select %9, %10, %0 : vector<8x256xi1>, vector<8x256xf32>
    %c-2147483648_i32_6 = arith.constant -2147483648 : i32
    %12 = vector.broadcast %c-2147483648_i32_6 : i32 to vector<8x256xi32>
    %13 = arith.cmpi ult, %3, %12 : vector<8x256xi32>
    %14 = arith.andi %13, %6 : vector<8x256xi1>
    %cst_7 = arith.constant dense<true> : vector<8x256xi1>
    %15 = arith.xori %9, %cst_7 : vector<8x256xi1>
    %16 = arith.andi %14, %15 : vector<8x256xi1>
    %17 = vector.shape_cast %11 : vector<8x256xf32> to vector<1x8x256xf32>
    %cst_8 = arith.constant dense<0xFF800000> : vector<1xf32>
    %18 = vector.multi_reduction <maximumf>, %17, %cst_8 [1, 2] : vector<1x8x256xf32> to vector<1xf32>
    %19 = vector.shape_cast %18 : vector<1xf32> to vector<1x1x1xf32>
    %20 = vector.extract %19[0, 0, 0] : f32 from vector<1x1x1xf32>
    %21 = vector.broadcast %20 : f32 to vector<1x1xf32>
    %c9_i32 = arith.constant 9 : i32
    %22 = vector.broadcast %c9_i32 : i32 to vector<8x256xi32>
    %23 = arith.shrui %4, %22 : vector<8x256xi32>
    %c1065353216_i32 = arith.constant 1065353216 : i32
    %24 = vector.broadcast %c1065353216_i32 : i32 to vector<8x256xi32>
    %25 = arith.ori %23, %24 : vector<8x256xi32>
    %26 = tpu.bitcast %25 : vector<8x256xi32> -> vector<8x256xf32>
    %cst_9 = arith.constant 1.000000e+00 : f32
    %27 = vector.broadcast %cst_9 : f32 to vector<8x256xf32>
    %28 = arith.subf %26, %27 : vector<8x256xf32>
    %29 = vector.broadcast %21 : vector<1x1xf32> to vector<8x256xf32>
    %30 = arith.mulf %29, %28 : vector<8x256xf32>
    %31 = math.roundeven %30 : vector<8x256xf32>
    %32 = arith.select %16, %31, %11 : vector<8x256xi1>, vector<8x256xf32>
    %c0_10 = arith.constant 0 : index
    %c0_11 = arith.constant 0 : index
    %33 = vector.load %arg2[%c0_10, %c0_11] : memref<8x256xf32, #tpu.memory_space<vmem>>, vector<8x256xf32>
    tpu.vector_store %arg2[%c0_10, %c0_11], %32 {strides = array<i32>} : memref<8x256xf32, #tpu.memory_space<vmem>>, vector<8x256xf32>,
    %34 = arith.extui %6 : vector<8x256xi1> to vector<8x256xi8>
    %c0_12 = arith.constant 0 : index
    %c0_13 = arith.constant 0 : index
    %35 = vector.load %arg3[%c0_12, %c0_13] : memref<8x256xi8, #tpu.memory_space<vmem>>, vector<8x256xi8>
    tpu.vector_store %arg3[%c0_12, %c0_13], %34 {strides = array<i32>} : memref<8x256xi8, #tpu.memory_space<vmem>>, vector<8x256xi8>,
    return
  }
}

</mosaic_0001>

<bundles_post_ra>
// kernel: tpu_custom_call.1
= control target key start
LH: loop header
LB: loop body
LE: loop exit
PB: predicated region body
PF: predicated region fallthrough
CT: control target
= control target key end

     0   :  { %9 = vsyncpa [#allocation3], 0  ;;  %s377_s0 = inlined_call_operand.hbm [shape: f32[8,256], index: 0, kind: input, shape index: {}]   ;;  %s378_s1 = inlined_call_operand.hbm [shape: u32[8,1024], index: 1, kind: input, shape index: {}]   ;;  %s379_s2 = inlined_call_operand.hbm [shape: f32[8,256], index: 2, kind: output, shape index: {0}]   ;;  %s380_s3 = inlined_call_operand.hbm [shape: s8[8,256], index: 3, kind: output, shape index: {1}]  }
   0x1   :  { %10 = vsyncpa [#allocation6], 0 }
   0x2   :  { %11 = vsyncpa [#allocation4], 0 }
   0x3   :  { %12 = vsyncpa [#allocation9], 0  ;;  %s18_s14 = sshll.u32 %s377_s0, 4  ;;  %s297_s15 = smov [#allocation2]   ;;  %s19_s14 = int_to_ptr.hbm [resolvable:$true] %s18_s14 }
   0x4   :  { %s20_s16 = sshll.u32 %s297_s15, 4  ;;  %s29_s19 = sshll.u32 %s378_s1, 4  ;;  %s21_s16 = int_to_ptr.vmem [resolvable:$true] %s20_s16  ;;  %s30_s19 = int_to_ptr.hbm [resolvable:$true] %s29_s19 }
   0x5   :  { %23 = dma.hbm_to_vmem [thread:$0]  %s19_s14, 256, %s21_s16, [#allocation3]  }
   0x6   :  { %s298_s20 = smov [#allocation5]  }
   0x7   :  { %s31_s21 = sshll.u32 %s298_s20, 4  ;;  %s32_s21 = int_to_ptr.vmem [resolvable:$true] %s31_s21 }
   0x8   :  { %34 = dma.hbm_to_vmem [thread:$0]  %s30_s19, 1024, %s32_s21, [#allocation6]  }
   0x9   :  { %289 = dma.done.wait [#allocation3], 256  }
   0xa   :  { %290 = vsyncadd [#allocation3], 4294967040 }
   0xb   :  { %291 = dma.done.wait [#allocation6], 1024  }
   0xc   :  { %292 = vsyncadd [#allocation6], 4294966272  ;;  %v47_v0 = vld [vmem:[#allocation5] sm:$0xff]  ;;  %v48_v1 = vld [vmem:[#allocation5 + $0x8] sm:$0xff]  ;;  %vm299_vm10 = vmmov 1   ;;  %v300_v28 = vmov 0  }
   0xd   :  { %v49_v2 = vld [vmem:[#allocation5 + $0x10] sm:$0xff]  ;;  %v50_v3 = vld [vmem:[#allocation5 + $0x18] sm:$0xff]  ;;  %v161_v4 = vxor.u32 2147483648, %v47_v0  ;;  %v51_v5 = vld [vmem:[#allocation5 + $0x20] sm:$0xff]  ;;  %v162_v7 = vxor.u32 2147483648, %v48_v1  ;;  %s301_s0 = smov [#allocation8]  }
   0xe   :  { %v52_v6 = vld [vmem:[#allocation5 + $0x28] sm:$0xff]  ;;  %v163_v8 = vxor.u32 2147483648, %v49_v2  ;;  %v164_v9 = vxor.u32 2147483648, %v50_v3  ;;  %v45_v10 = vld [vmem:[#allocation2] sm:$0xff]  ;;  %v165_v12 = vxor.u32 2147483648, %v51_v5  ;;  %v46_v14 = vld [vmem:[#allocation2 + $0x8] sm:$0xff] }
   0xf   :  { %vm329_vm0 = vcmp.lt.s32.totalorder %v161_v4, 0  ;;  %v166_v13 = vxor.u32 2147483648, %v52_v6  ;;  %vm333_vm1 = vcmp.lt.s32.totalorder %v162_v7, 0  ;;  %s143_s1 = sshll.u32 %s301_s0, 4  ;;  %s145_s24 = sshll.u32 %s380_s3, 4  ;;  %v53_v39 = vld [vmem:[#allocation5 + $0x30] sm:$0xff]  ;;  %s144_s1 = int_to_ptr.vmem [resolvable:$true] %s143_s1  ;;  %s146_s24 = int_to_ptr.hbm [resolvable:$true] %s145_s24 }
  0x10   :  { %vm63_vm2 = vcmp.lt.s32.totalorder %v163_v8, 429496730  ;;  %vm66_vm3 = vcmp.lt.s32.totalorder %v164_v9, 429496730  ;;  %vm73_vm5 = vcmp.lt.s32.totalorder %v165_v12, 0  ;;  %vm110_vm15 = vmpackc.low %vm329_vm0, %vm329_vm0  ;;  %v54_v40 = vld [vmem:[#allocation5 + $0x38] sm:$0xff] }
  0x11   :  { %vm67_vm4 = vmand %vm63_vm2, %vm329_vm0  ;;  %vm76_vm6 = vcmp.lt.s32.totalorder %v166_v13, 0  ;;  %v111_v29 = vsel %vm110_vm15, 16711935, %v300_v28  ;;  %v93_v41 = vshrl.u32 %v53_v39, 9  ;;  %v94_v42 = vshrl.u32 %v54_v40, 9  ;;  %s302_s3 = smov [#allocation7]  }
  0x12   :  { %vm68_vm7 = vmand %vm66_vm3, %vm333_vm1  ;;  %v341_v16 = vsel %vm67_vm4, 0.0, %v45_v10  ;;  %v113_v31 = vpack.c.b8 %v111_v29, %v111_v29  ;;  %s132_s26 = sshll.u32 %s302_s3, 4  ;;  %s134_s29 = sshll.u32 %s379_s2, 4  ;;  %s133_s26 = int_to_ptr.vmem [resolvable:$true] %s132_s26  ;;  %s135_s29 = int_to_ptr.hbm [resolvable:$true] %s134_s29 }
  0x13   :  { %v343_v17 = vsel %vm68_vm7, 0.0, %v46_v14  ;;  %vm77_vm8 = vmand %vm73_vm5, %vm329_vm0  ;;  %v95_v43 = vor.u32 1065353216, %v93_v41  ;;  %v96_v44 = vor.u32 1065353216, %v94_v42 }
  0x14   :  { %vm78_vm9 = vmand %vm76_vm6, %vm333_vm1  ;;  %v83_v18 = vmax.f32 %v341_v16, %v343_v17  ;;  %vm114_vm3 = vnez %v113_v31 }
  0x15   :  { %vm79_vm11 = vmxor %vm67_vm4, %vm299_vm10  ;;  %v120_v33 = vsel %vm114_vm3, 16843009, %v300_v28  ;;  %v167_v45 = vadd.f32 -1.0, %v95_v43  ;;  %v168_v46 = vadd.f32 -1.0, %v96_v44 }
  0x16   :  { %vm80_vm12 = vmxor %vm68_vm7, %vm299_vm10  ;;  %84 = vmax.xlane.f32.xlu0 %v83_v18  ;;  %v122_v35 = vunpack.c.0.s8 %v120_v33 }
  0x17   :  { %vm351_vm13 = vmand %vm77_vm8, %vm79_vm11 }
  0x18   :  { %vm355_vm14 = vmand %vm78_vm9, %vm80_vm12 }
  0x19   :  { %vm115_vm2 = vmpackc.low %vm333_vm1, %vm333_vm1 }
  0x1a   :  { %v116_v30 = vsel %vm115_vm2, 16711935, %v300_v28 }
  0x1b   :  { %v118_v32 = vpack.c.b8 %v116_v30, %v116_v30 }
  0x1d   :  { %vm119_vm4 = vnez %v118_v32 }
  0x1e   :  { %v121_v34 = vsel %vm119_vm4, 16843009, %v300_v28 }
  0x1f   :  { %v123_v36 = vunpack.c.0.s8 %v121_v34 }
  0x21   :  { %v124_v37 = vpack.c.b16 %v123_v36, %v122_v35 }
  0x23   :  { %v125_v38 = vpack.c.b8 %v124_v37, %v124_v37 }
  0x25   :  { %126 = vst [vmem:[#allocation8] sm:$0xf] %v125_v38 }
  0x26   :  { %148 = dma.vmem_to_hbm [thread:$0]  %s144_s1, 64, %s146_s24, [#allocation9]  }
  0x89   :  { %v85_v21 = vpop.xlane.xlu0 %84 }
  0x8a   :  { %v86_v22 = vrot.slane %v85_v21, 4 }
  0x8c   :  { %v87_v23 = vmax.f32 %v85_v21, %v86_v22 }
  0x8e   :  { %v88_v24 = vrot.slane %v87_v23, 2 }
  0x90   :  { %v89_v25 = vmax.f32 %v87_v23, %v88_v24 }
  0x92   :  { %v90_v26 = vrot.slane %v89_v25, 1 }
  0x94   :  { %v91_v27 = vmax.f32 %v89_v25, %v90_v26 }
  0x96   :  { %169 = vpush %v91_v27 }
  0xc7   :  { %s170_s25 = spop %169 }
  0xc8   :  { %v101_v47 = vstv %s170_s25 }
  0xc9   :  { %v102_v48 = vmul.f32 %v167_v45, %v101_v47  ;;  %v103_v49 = vmul.f32 %v168_v46, %v101_v47 }
  0xcb   :  { %v173_v50 = vcvt.f32.s32 %v102_v48  ;;  %v181_v51 = vcvt.f32.s32 %v103_v49  ;;  %v171_v53 = vand.u32 2147483647, %v102_v48  ;;  %v176_v56 = vand.u32 2147483648, %v102_v48 }
  0xcc   :  { %v179_v57 = vand.u32 2147483647, %v103_v49  ;;  %v184_v59 = vand.u32 2147483648, %v103_v49 }
  0xcd   :  { %v174_v52 = vcvt.s32.f32 %v173_v50  ;;  %v182_v54 = vcvt.s32.f32 %v181_v51  ;;  %vm172_vm0 = vcmp.lt.f32.partialorder %v171_v53, 8388608.0 }
  0xce   :  { %vm180_vm1 = vcmp.lt.f32.partialorder %v179_v57, 8388608.0 }
  0xcf   :  { %v175_v55 = vand.u32 2147483647, %v174_v52  ;;  %v183_v58 = vand.u32 2147483647, %v182_v54 }
  0xd1   :  { %v177_v60 = vor.u32 %v176_v56, %v175_v55  ;;  %v185_v61 = vor.u32 %v184_v59, %v183_v58 }
  0xd3   :  { %v178_v62 = vsel %vm172_vm0, %v177_v60, %v102_v48  ;;  %v186_v63 = vsel %vm180_vm1, %v185_v61, %v103_v49 }
  0xd4   :  { %v106_v0 = vsel %vm351_vm13, %v178_v62, %v341_v16  ;;  %v107_v1 = vsel %vm355_vm14, %v186_v63, %v343_v17 }
  0xd5   :  { %108 = vst [vmem:[#allocation7] sm:$0xff] %v106_v0 }
  0xd6   :  { %109 = vst [vmem:[#allocation7 + $0x8] sm:$0xff] %v107_v1 }
  0xd7   :  { %137 = dma.vmem_to_hbm [thread:$0]  %s133_s26, 256, %s135_s29, [#allocation4]  }
  0xd8   :  { %293 = dma.done.wait [#allocation4], 256  }
  0xd9   :  { %294 = vsyncadd [#allocation4], 4294967040 }
  0xda   :  { %295 = dma.done.wait [#allocation9], 64  }
  0xdb   :  { %296 = vsyncadd [#allocation9], 4294967232 }
  0xdc   :  { %157 = vsyncpa [#allocation3], 1 }
  0xdd   :  { %158 = vsyncpa [#allocation6], 1 }
  0xde   :  { %159 = vsyncpa [#allocation4], 1 }
  0xdf   :  { %160 = vsyncpa [#allocation9], 1 }

</bundles_post_ra>
